<compile_context>
chip_gen: v5e
topology: v5e:2x2
jax: 0.10.0
libtpu: 0.0.40
codegen_flags: <defaults>
</compile_context>

<pallas_src>
import jax
import jax.numpy as jnp
from jax.experimental import pallas as pl
from jax.experimental.pallas import tpu as pltpu

LANES = 128      # vreg lane width
SUBLANES = 8     # vreg sublane count (f32)


def xornet_kernel(params_ref, x_ref, o_ref):
    # params_ref: (9,) f32 in SMEM -> [W1_00, W1_01, W1_10, W1_11, b1_0, b1_1,
    #                                  W2_00, W2_01, b2_0]  (PyTorch (out,in) order)
    # x_ref: (2, TR, 128) f32 in VMEM -> x_ref[0] = feature 0, x_ref[1] = feature 1,
    #                                    (TR, 128) = (sublane, lane)-dense batch tile
    # o_ref: (TR, 128) f32 in VMEM
    x0 = x_ref[0]                       # (TR, 128)
    x1 = x_ref[1]                       # (TR, 128)

    w1_00 = params_ref[0]
    w1_01 = params_ref[1]
    w1_10 = params_ref[2]
    w1_11 = params_ref[3]
    b1_0 = params_ref[4]
    b1_1 = params_ref[5]
    w2_00 = params_ref[6]
    w2_01 = params_ref[7]
    b2_0 = params_ref[8]

    def sigmoid(z):
        # Single EUP transcendental per activation (vs exp + divide).
        return 0.5 * jnp.tanh(0.5 * z) + 0.5

    # Layer 1: h_j = sigmoid(W1[j,0]*x0 + W1[j,1]*x1 + b1[j])  (VPU FMAs + EUP tanh)
    h0 = sigmoid(x0 * w1_00 + x1 * w1_01 + b1_0)
    h1 = sigmoid(x0 * w1_10 + x1 * w1_11 + b1_1)

    # Layer 2: y = sigmoid(W2[0,0]*h0 + W2[0,1]*h1 + b2[0])
    o_ref[...] = sigmoid(h0 * w2_00 + h1 * w2_01 + b2_0)


def xornet_forward(x, w1, b1, w2, b2, *, block_b=512 * 1024):
    """x: (B, 2) f32. Weights in PyTorch layout: w1 (2,2)=(out,in), b1 (2,),
    w2 (1,2)=(out,in), b2 (1,). Returns (B, 1) f32."""
    B = x.shape[0]

    # Batch laid out as (rows, 128) lanes; rows rounded up to a multiple of 8 sublanes.
    rows = pl.cdiv(B, LANES)
    rows = ((rows + SUBLANES - 1) // SUBLANES) * SUBLANES
    padded_B = rows * LANES

    # Tile rows: multiple of 8 sublanes, clamped to the batch; keep >= 2 grid
    # steps whenever possible so both v7x TensorCores get work.
    block_rows = max(SUBLANES, (int(block_b) // LANES // SUBLANES) * SUBLANES)
    tr = min(block_rows, rows)
    if rows > SUBLANES:
        half_rows = ((pl.cdiv(rows, 2) + SUBLANES - 1) // SUBLANES) * SUBLANES
        tr = min(tr, half_rows)
    grid_r = pl.cdiv(rows, tr)

    # Feature-major layout, minimal padding (to the 8x128 row boundary only).
    xt = jnp.pad(x.T.astype(jnp.float32), ((0, 0), (0, padded_B - B)))
    xt = xt.reshape(2, rows, LANES)

    # Pack all 9 parameters into one small f32 array that lives in SMEM.
    params = jnp.concatenate(
        [w1.reshape(-1), b1.reshape(-1), w2.reshape(-1), b2.reshape(-1)]
    ).astype(jnp.float32)                                                # (9,)

    # VMEM footprint: double-buffered input (2*tr*128 f32) + output (tr*128 f32).
    tile_bytes = tr * LANES * 4
    vmem_bytes = 2 * (2 * tile_bytes) + 2 * tile_bytes          # ~24 bytes / batch elem
    vmem_limit = min(vmem_bytes + (4 << 20), 48 << 20)

    out = pl.pallas_call(
        xornet_kernel,
        grid=(grid_r,),
        in_specs=[
            pl.BlockSpec(memory_space=pltpu.MemorySpace.SMEM),           # params -> SMEM scalars
            pl.BlockSpec((2, tr, LANES), lambda i: (0, i, 0)),           # (2, TR, 128) input tile
        ],
        out_specs=pl.BlockSpec((tr, LANES), lambda i: (i, 0)),           # (TR, 128) output tile
        out_shape=jax.ShapeDtypeStruct((rows, LANES), jnp.float32),
        compiler_params=pltpu.CompilerParams(
            dimension_semantics=("parallel",),
            vmem_limit_bytes=vmem_limit,
        ),
    )(params, xt)

    return out.reshape(-1)[:B].reshape(B, 1)


def init_params(key):
    # Mimic nn.Linear init: uniform(-1/sqrt(fan_in), 1/sqrt(fan_in)), PyTorch (out, in) layout.
    k1, k2, k3, k4 = jax.random.split(key, 4)
    bound = 1.0 / jnp.sqrt(2.0)  # fan_in = 2 for both layers
    w1 = jax.random.uniform(k1, (2, 2), jnp.float32, -bound, bound)   # layer1.weight (out=2, in=2)
    b1 = jax.random.uniform(k2, (2,), jnp.float32, -bound, bound)     # layer1.bias
    w2 = jax.random.uniform(k3, (1, 2), jnp.float32, -bound, bound)   # layer2.weight (out=1, in=2)
    b2 = jax.random.uniform(k4, (1,), jnp.float32, -bound, bound)     # layer2.bias
    return w1, b1, w2, b2


def reference_forward(x, w1, b1, w2, b2):
    h = jax.nn.sigmoid(x @ w1.T + b1)
    return jax.nn.sigmoid(h @ w2.T + b2)


if __name__ == "__main__":
    key = jax.random.PRNGKey(0)
    kx, kp, kx2, kx3 = jax.random.split(key, 4)

    w1, b1, w2, b2 = init_params(kp)

    # 1) Canonical XOR inputs (batch=4, features=2) with a little noise.
    x = jnp.array([[0.0, 0.0], [0.0, 1.0], [1.0, 0.0], [1.0, 1.0]], dtype=jnp.float32)
    x = x + 0.01 * jax.random.normal(kx, x.shape, dtype=jnp.float32)

    out = jax.block_until_ready(xornet_forward(x, w1, b1, w2, b2))
    ref = reference_forward(x, w1, b1, w2, b2)
    assert out.shape == (4, 1), out.shape
    assert jnp.allclose(out, ref, atol=1e-5, rtol=1e-5), (out, ref)

    # 2) Ragged batch, padded to one (8,128) block (B=300 -> 8 rows of 128 lanes).
    x_big = jax.random.normal(kx2, (300, 2), dtype=jnp.float32)
    out_big = jax.block_until_ready(xornet_forward(x_big, w1, b1, w2, b2))
    ref_big = reference_forward(x_big, w1, b1, w2, b2)
    assert out_big.shape == (300, 1), out_big.shape
    assert jnp.allclose(out_big, ref_big, atol=1e-5, rtol=1e-5)

    # 3) Multi-block grid with a partial trailing block (B=3000 -> 24 rows,
    #    block_b=1024 -> 8-row tiles -> grid of 3) to exercise cdiv grid + masking.
    x_multi = jax.random.normal(kx3, (3000, 2), dtype=jnp.float32)
    out_multi = jax.block_until_ready(
        xornet_forward(x_multi, w1, b1, w2, b2, block_b=1024))
    ref_multi = reference_forward(x_multi, w1, b1, w2, b2)
    assert out_multi.shape == (3000, 1), out_multi.shape
    assert jnp.allclose(out_multi, ref_multi, atol=1e-5, rtol=1e-5)

    print("KERNEL_OK")
</pallas_src>

<mosaic_0001>
module attributes {stable_mosaic.version = 11 : i64} {
  func.func @xornet_kernel(%arg0: i32, %arg1: memref<9xf32, #tpu.memory_space<smem>>, %arg2: memref<2x8x128xf32, #tpu.memory_space<vmem>>, %arg3: memref<8x128xf32, #tpu.memory_space<vmem>>) attributes {dimension_semantics = [#tpu.dimension_semantics<parallel>], iteration_bounds = array<i64: 1>, scalar_prefetch = 0 : i64, scratch_operands = 0 : i64, tpu.core_type = #tpu.core_type<tc>, window_params = [{transform_indices = @transform_0, window_bounds = array<i64: 9>}, {transform_indices = @transform_1, window_bounds = array<i64: 2, 8, 128>}, {transform_indices = @transform_2, window_bounds = array<i64: 8, 128>}]} {
    %c0 = arith.constant 0 : index
    %c0_0 = arith.constant 0 : index
    %c0_1 = arith.constant 0 : index
    %0 = vector.load %arg2[%c0, %c0_0, %c0_1] : memref<2x8x128xf32, #tpu.memory_space<vmem>>, vector<1x8x128xf32>
    %1 = vector.shape_cast %0 : vector<1x8x128xf32> to vector<8x128xf32>
    %c1 = arith.constant 1 : index
    %c0_2 = arith.constant 0 : index
    %c0_3 = arith.constant 0 : index
    %2 = vector.load %arg2[%c1, %c0_2, %c0_3] : memref<2x8x128xf32, #tpu.memory_space<vmem>>, vector<1x8x128xf32>
    %3 = vector.shape_cast %2 : vector<1x8x128xf32> to vector<8x128xf32>
    %c0_4 = arith.constant 0 : index
    %4 = memref.load %arg1[%c0_4] : memref<9xf32, #tpu.memory_space<smem>>
    %c1_5 = arith.constant 1 : index
    %5 = memref.load %arg1[%c1_5] : memref<9xf32, #tpu.memory_space<smem>>
    %c2 = arith.constant 2 : index
    %6 = memref.load %arg1[%c2] : memref<9xf32, #tpu.memory_space<smem>>
    %c3 = arith.constant 3 : index
    %7 = memref.load %arg1[%c3] : memref<9xf32, #tpu.memory_space<smem>>
    %c4 = arith.constant 4 : index
    %8 = memref.load %arg1[%c4] : memref<9xf32, #tpu.memory_space<smem>>
    %c5 = arith.constant 5 : index
    %9 = memref.load %arg1[%c5] : memref<9xf32, #tpu.memory_space<smem>>
    %c6 = arith.constant 6 : index
    %10 = memref.load %arg1[%c6] : memref<9xf32, #tpu.memory_space<smem>>
    %c7 = arith.constant 7 : index
    %11 = memref.load %arg1[%c7] : memref<9xf32, #tpu.memory_space<smem>>
    %c8 = arith.constant 8 : index
    %12 = memref.load %arg1[%c8] : memref<9xf32, #tpu.memory_space<smem>>
    %13 = vector.broadcast %4 : f32 to vector<8x128xf32>
    %14 = arith.mulf %1, %13 : vector<8x128xf32>
    %15 = vector.broadcast %5 : f32 to vector<8x128xf32>
    %16 = arith.mulf %3, %15 : vector<8x128xf32>
    %17 = arith.addf %14, %16 : vector<8x128xf32>
    %18 = vector.broadcast %8 : f32 to vector<8x128xf32>
    %19 = arith.addf %17, %18 : vector<8x128xf32>
    %cst = arith.constant 5.000000e-01 : f32
    %20 = vector.broadcast %cst : f32 to vector<8x128xf32>
    %21 = arith.mulf %20, %19 : vector<8x128xf32>
    %22 = math.tanh %21 : vector<8x128xf32>
    %cst_6 = arith.constant 5.000000e-01 : f32
    %23 = vector.broadcast %cst_6 : f32 to vector<8x128xf32>
    %24 = arith.mulf %23, %22 : vector<8x128xf32>
    %cst_7 = arith.constant 5.000000e-01 : f32
    %25 = vector.broadcast %cst_7 : f32 to vector<8x128xf32>
    %26 = arith.addf %24, %25 : vector<8x128xf32>
    %27 = vector.broadcast %6 : f32 to vector<8x128xf32>
    %28 = arith.mulf %1, %27 : vector<8x128xf32>
    %29 = vector.broadcast %7 : f32 to vector<8x128xf32>
    %30 = arith.mulf %3, %29 : vector<8x128xf32>
    %31 = arith.addf %28, %30 : vector<8x128xf32>
    %32 = vector.broadcast %9 : f32 to vector<8x128xf32>
    %33 = arith.addf %31, %32 : vector<8x128xf32>
    %cst_8 = arith.constant 5.000000e-01 : f32
    %34 = vector.broadcast %cst_8 : f32 to vector<8x128xf32>
    %35 = arith.mulf %34, %33 : vector<8x128xf32>
    %36 = math.tanh %35 : vector<8x128xf32>
    %cst_9 = arith.constant 5.000000e-01 : f32
    %37 = vector.broadcast %cst_9 : f32 to vector<8x128xf32>
    %38 = arith.mulf %37, %36 : vector<8x128xf32>
    %cst_10 = arith.constant 5.000000e-01 : f32
    %39 = vector.broadcast %cst_10 : f32 to vector<8x128xf32>
    %40 = arith.addf %38, %39 : vector<8x128xf32>
    %41 = vector.broadcast %10 : f32 to vector<8x128xf32>
    %42 = arith.mulf %26, %41 : vector<8x128xf32>
    %43 = vector.broadcast %11 : f32 to vector<8x128xf32>
    %44 = arith.mulf %40, %43 : vector<8x128xf32>
    %45 = arith.addf %42, %44 : vector<8x128xf32>
    %46 = vector.broadcast %12 : f32 to vector<8x128xf32>
    %47 = arith.addf %45, %46 : vector<8x128xf32>
    %cst_11 = arith.constant 5.000000e-01 : f32
    %48 = vector.broadcast %cst_11 : f32 to vector<8x128xf32>
    %49 = arith.mulf %48, %47 : vector<8x128xf32>
    %50 = math.tanh %49 : vector<8x128xf32>
    %cst_12 = arith.constant 5.000000e-01 : f32
    %51 = vector.broadcast %cst_12 : f32 to vector<8x128xf32>
    %52 = arith.mulf %51, %50 : vector<8x128xf32>
    %cst_13 = arith.constant 5.000000e-01 : f32
    %53 = vector.broadcast %cst_13 : f32 to vector<8x128xf32>
    %54 = arith.addf %52, %53 : vector<8x128xf32>
    %c0_14 = arith.constant 0 : index
    %c0_15 = arith.constant 0 : index
    %55 = vector.load %arg3[%c0_14, %c0_15] : memref<8x128xf32, #tpu.memory_space<vmem>>, vector<8x128xf32>
    tpu.vector_store %arg3[%c0_14, %c0_15], %54 {strides = array<i32>} : memref<8x128xf32, #tpu.memory_space<vmem>>, vector<8x128xf32>,
    return
  }
  func.func @transform_0(%arg0: i32) -> i32 {
    %c0_i32 = arith.constant 0 : i32
    %c0_i32_0 = arith.constant 0 : i32
    return %c0_i32 : i32
  }
  func.func @transform_1(%arg0: i32) -> (i32, i32, i32) {
    %c0_i32 = arith.constant 0 : i32
    %c0_i32_0 = arith.constant 0 : i32
    %c0_i32_1 = arith.constant 0 : i32
    return %c0_i32, %arg0, %c0_i32_0 : i32, i32, i32
  }
  func.func @transform_2(%arg0: i32) -> (i32, i32) {
    %c0_i32 = arith.constant 0 : i32
    %c0_i32_0 = arith.constant 0 : i32
    return %arg0, %c0_i32 : i32, i32
  }
}

</mosaic_0001>

<bundles_post_ra>
// kernel: tpu_custom_call.1
= control target key start
LH: loop header
LB: loop body
LE: loop exit
PB: predicated region body
PF: predicated region fallthrough
CT: control target
= control target key end

     0   :  { %7 = vsyncpa [#allocation5], 0  ;;  %s219_s0 = inlined_call_operand.hbm [shape: f32[9], index: 0, kind: input, shape index: {}]   ;;  %s220_s1 = inlined_call_operand.hbm [shape: f32[2,8,128], index: 1, kind: input, shape index: {}]   ;;  %s221_s2 = inlined_call_operand.hbm [shape: f32[8,128], index: 2, kind: output, shape index: {}]  }
   0x1   :  { %8 = vsyncpa [#allocation3], 0 }
   0x2   :  { %9 = vsyncpa [#allocation4], 0  ;;  %s15_s11 = sshll.u32 %s219_s0, 4  ;;  %s23_s14 = sshll.u32 %s220_s1, 4  ;;  %s16_s11 = int_to_ptr.hbm [resolvable:$true] %s15_s11  ;;  %s24_s14 = int_to_ptr.hbm [resolvable:$true] %s23_s14 }
   0x3   :  { %s190_s15 = smov [#allocation2]   ;;  %s191_s16 = smov [#allocation6]  }
   0x4   :  { %18 = dma.hbm_to_smem %s16_s11, 16, %s190_s15, [#allocation5]  }
   0x5   :  { %s25_s17 = sshll.u32 %s191_s16, 4  ;;  %s192_s18 = smov 128   ;;  %s26_s17 = int_to_ptr.vmem [resolvable:$true] %s25_s17 }
   0x6   :  { %s193_s19 = smov 8  }
   0x7   :  { %31 = dma.hbm_to_vmem [thread:$0]  %s24_s14, 256, %s26_s17, [#allocation3], %s192_s18, %s192_s18, %s193_s19  }
   0x8   :  { %184 = dma.done.wait [#allocation5], 16  }
   0x9   :  { %185 = vsyncadd [#allocation5], 4294967280 }
   0xa   :  { %186 = dma.done.wait [#allocation3], 256  }
   0xb   :  { %187 = vsyncadd [#allocation3], 4294967040 }
   0xc   :  { %40 = sfence }
   0xd   :  { %s44_s0 = sld [smem:[#allocation2]]  ;;  %v41_v0 = vld [vmem:[#allocation6] sm:$0xff]  ;;  %v43_v1 = vld [vmem:[#allocation6 + $0x8] sm:$0xff]  ;;  %s194_s27 = smov [#allocation7]  }
   0xe   :  { %s105_s20 = sld [smem:[#allocation2 + $0x1]]  ;;  %s92_s28 = sshll.u32 %s194_s27, 4  ;;  %s93_s28 = int_to_ptr.vmem [resolvable:$true] %s92_s28 }
   0xf   :  { %s106_s21 = sld [smem:[#allocation2 + $0x2]]  ;;  %s94_s3 = sshll.u32 %s221_s2, 4  ;;  %s95_s3 = int_to_ptr.hbm [resolvable:$true] %s94_s3 }
  0x10   :  { %s107_s22 = sld [smem:[#allocation2 + $0x3]] }
  0x11   :  { %s108_s1 = sld [smem:[#allocation2 + $0x4]] }
  0x12   :  { %s109_s23 = sld [smem:[#allocation2 + $0x5]] }
  0x13   :  { %v53_v2 = vstv %s44_s0  ;;  %s110_s24 = sld [smem:[#allocation2 + $0x6]] }
  0x14   :  { %v54_v3 = vmul.f32 %v53_v2, %v41_v0  ;;  %v55_v4 = vstv %s105_s20  ;;  %s111_s25 = sld [smem:[#allocation2 + $0x7]] }
  0x15   :  { %v56_v5 = vmul.f32 %v55_v4, %v43_v1  ;;  %v64_v6 = vstv %s106_s21  ;;  %s112_s26 = sld [smem:[#allocation2 + $0x8]] }
  0x16   :  { %v65_v7 = vmul.f32 %v64_v6, %v41_v0  ;;  %v66_v8 = vstv %s107_s22 }
  0x17   :  { %v57_v9 = vadd.f32 %v56_v5, %v54_v3  ;;  %v58_v10 = vstv %s108_s1  ;;  %v67_v11 = vmul.f32 %v66_v8, %v43_v1 }
  0x18   :  { %v69_v12 = vstv %s109_s23 }
  0x19   :  { %v59_v13 = vadd.f32 %v58_v10, %v57_v9  ;;  %v68_v14 = vadd.f32 %v67_v11, %v65_v7  ;;  %v75_v21 = vstv %s110_s24 }
  0x1a   :  { %v77_v24 = vstv %s111_s25 }
  0x1b   :  { %v60_v15 = vmul.f32 0.5, %v59_v13  ;;  %v70_v16 = vadd.f32 %v69_v12, %v68_v14  ;;  %v80_v28 = vstv %s112_s26 }
  0x1d   :  { %118 = vtanh.f32 %v60_v15  ;;  %v71_v17 = vmul.f32 0.5, %v70_v16 }
  0x1f   :  { %120 = vtanh.f32 %v71_v17 }
  0x23   :  { %v119_v18 = vpop.eup %118 }
  0x24   :  { %v62_v19 = vmul.f32 0.5, %v119_v18 }
  0x25   :  { %v121_v20 = vpop.eup %120 }
  0x26   :  { %v63_v22 = vadd.f32 0.5, %v62_v19  ;;  %v73_v23 = vmul.f32 0.5, %v121_v20 }
  0x28   :  { %v74_v25 = vadd.f32 0.5, %v73_v23  ;;  %v76_v26 = vmul.f32 %v75_v21, %v63_v22 }
  0x2a   :  { %v78_v27 = vmul.f32 %v77_v24, %v74_v25 }
  0x2c   :  { %v79_v29 = vadd.f32 %v78_v27, %v76_v26 }
  0x2e   :  { %v81_v30 = vadd.f32 %v80_v28, %v79_v29 }
  0x30   :  { %v82_v31 = vmul.f32 0.5, %v81_v30 }
  0x32   :  { %122 = vtanh.f32 %v82_v31 }
  0x38   :  { %v123_v32 = vpop.eup %122 }
  0x39   :  { %v84_v33 = vmul.f32 0.5, %v123_v32 }
  0x3b   :  { %v85_v34 = vadd.f32 0.5, %v84_v33 }
  0x3d   :  { %86 = vst [vmem:[#allocation7] sm:$0xff] %v85_v34 }
  0x3e   :  { %97 = dma.vmem_to_hbm [thread:$0]  %s93_s28, 128, %s95_s3, [#allocation4]  }
  0x3f   :  { %188 = dma.done.wait [#allocation4], 128  }
  0x40   :  { %189 = vsyncadd [#allocation4], 4294967168 }
  0x41   :  { %102 = vsyncpa [#allocation3], 1 }
  0x42   :  { %103 = vsyncpa [#allocation4], 1 }
  0x43   :  { %104 = vsyncpa [#allocation5], 1 }

</bundles_post_ra>
